<compile_context>
chip_gen: v7x
topology: tpu7x:2x2x1
jax: 0.10.0
libtpu: 0.0.40
codegen_flags: <defaults>
</compile_context>

<pallas_src>
import jax
import jax.numpy as jnp
from jax.experimental import pallas as pl
from jax.experimental.pallas import tpu as pltpu

HIDDEN = 128


def _round_up(x, m):
    return ((x + m - 1) // m) * m


def qnet_kernel(x_ref, w1_ref, b1_ref, w2_ref, b2_ref, w3_ref, b3_ref, o_ref):
    # Compute dtype follows the weights (bf16 after prepare_qnet_params, or f32
    # if the caller wants strict parity). Accumulation is always f32.
    cdt = w1_ref.dtype

    # Layer 1: Linear + ReLU (K = state_dim, padded in-register by Mosaic).
    h1 = jnp.dot(x_ref[...].astype(cdt), w1_ref[...],
                 preferred_element_type=jnp.float32)
    h1 = jnp.maximum(h1 + b1_ref[...].astype(jnp.float32), 0.0)

    # Layer 2: Linear + ReLU.
    h2 = jnp.dot(h1.astype(cdt), w2_ref[...],
                 preferred_element_type=jnp.float32)
    h2 = jnp.maximum(h2 + b2_ref[...].astype(jnp.float32), 0.0)

    # Layer 3: Linear (no activation). Output block is (TB, action_dim) — only
    # the real Q-values are stored.
    out = jnp.dot(h2.astype(cdt), w3_ref[...],
                  preferred_element_type=jnp.float32)
    o_ref[...] = (out + b3_ref[...].astype(jnp.float32)).astype(o_ref.dtype)


def qnet_forward(x, w1, b1, w2, b2, w3, b3):
    batch, state_dim = x.shape
    action_dim = w3.shape[1]

    # Batch tile: multiple of 8, capped at 1024 rows (roofline gain flattens
    # past that and v5e's 16 MiB scoped-VMEM default stays comfortable), and
    # chosen as ~ceil(batch/2) so the grid has >= 2 steps whenever batch > 8 —
    # required for the "parallel" axis to shard across v7x's 2 TensorCores.
    tb = min(1024, _round_up(max(1, (batch + 1) // 2), 8))
    b_pad = _round_up(batch, tb)
    x_p = jnp.pad(x, ((0, b_pad - batch), (0, 0))) if b_pad != batch else x

    grid = (b_pad // tb,)

    # Weights / biases: same block every grid step -> resident in VMEM.
    def resident(arr):
        return pl.BlockSpec(arr.shape, lambda i: (0,) * arr.ndim)

    out = pl.pallas_call(
        qnet_kernel,
        out_shape=jax.ShapeDtypeStruct((b_pad, action_dim), jnp.float32),
        grid=grid,
        in_specs=[
            pl.BlockSpec((tb, state_dim), lambda i: (i, 0)),   # x tile
            resident(w1), resident(b1),
            resident(w2), resident(b2),
            resident(w3), resident(b3),
        ],
        out_specs=pl.BlockSpec((tb, action_dim), lambda i: (i, 0)),
        compiler_params=pltpu.CompilerParams(
            dimension_semantics=("parallel",),   # batch sharded across v7x TCs
        ),
    )(x_p, w1, b1, w2, b2, w3, b3)

    # Drop padded batch rows (no column slicing needed — output is unpadded).
    return out[:batch] if b_pad != batch else out


def prepare_qnet_params(w1, b1, w2, b2, w3, b3, compute_dtype=jnp.bfloat16):
    """One-time transform (call at init, NOT per step): cast weights to the MXU
    input dtype. Biases stay f32 (added after the f32 accumulation)."""
    return (w1.astype(compute_dtype), b1.astype(jnp.float32),
            w2.astype(compute_dtype), b2.astype(jnp.float32),
            w3.astype(compute_dtype), b3.astype(jnp.float32))


def init_qnet_params(key, state_dim, action_dim, hidden=HIDDEN):
    """Deterministic init mimicking PyTorch nn.Linear default (uniform ±1/sqrt(fan_in)).
    Weights are stored [in_features, out_features] so each layer is x @ W + b."""
    def linear(k, fan_in, fan_out):
        kw, kb = jax.random.split(k)
        bound = 1.0 / jnp.sqrt(fan_in)
        w = jax.random.uniform(kw, (fan_in, fan_out), jnp.float32, -bound, bound)
        b = jax.random.uniform(kb, (1, fan_out), jnp.float32, -bound, bound)
        return w, b

    k1, k2, k3 = jax.random.split(key, 3)
    w1, b1 = linear(k1, state_dim, hidden)
    w2, b2 = linear(k2, hidden, hidden)
    w3, b3 = linear(k3, hidden, action_dim)
    return w1, b1, w2, b2, w3, b3


def qnet_reference(x, w1, b1, w2, b2, w3, b3):
    """Pure-JAX reference using the same cast pattern as the kernel
    (bf16 or f32 inputs per the weights' dtype, f32 accumulation)."""
    cdt = w1.dtype
    h1 = jnp.maximum(
        jnp.dot(x.astype(cdt), w1, preferred_element_type=jnp.float32) + b1, 0.0)
    h2 = jnp.maximum(
        jnp.dot(h1.astype(cdt), w2, preferred_element_type=jnp.float32) + b2, 0.0)
    return jnp.dot(h2.astype(cdt), w3, preferred_element_type=jnp.float32) + b3


if __name__ == "__main__":
    state_dim, action_dim, batch = 4, 2, 48

    key = jax.random.PRNGKey(0)
    kx, kp = jax.random.split(key)
    x = jax.random.normal(kx, (batch, state_dim), dtype=jnp.float32)

    params_f32 = init_qnet_params(kp, state_dim, action_dim)
    params = prepare_qnet_params(*params_f32)        # one-time bf16 cast

    out = qnet_forward(x, *params)
    out = jax.block_until_ready(out)
    assert out.shape == (batch, action_dim)

    ref = qnet_reference(x, *params)
    assert jnp.allclose(out, ref, atol=1e-3, rtol=1e-3), "mismatch vs reference"

    print("KERNEL_OK")
</pallas_src>

<mosaic_0001>
module attributes {stable_mosaic.version = 11 : i64} {
  func.func @qnet_kernel(%arg0: i32, %arg1: memref<24x4xf32, #tpu.memory_space<vmem>>, %arg2: memref<4x128xbf16, #tpu.memory_space<vmem>>, %arg3: memref<1x128xf32, #tpu.memory_space<vmem>>, %arg4: memref<128x128xbf16, #tpu.memory_space<vmem>>, %arg5: memref<1x128xf32, #tpu.memory_space<vmem>>, %arg6: memref<128x2xbf16, #tpu.memory_space<vmem>>, %arg7: memref<1x2xf32, #tpu.memory_space<vmem>>, %arg8: memref<24x2xf32, #tpu.memory_space<vmem>>) attributes {dimension_semantics = [#tpu.dimension_semantics<parallel>], iteration_bounds = array<i64: 2>, scalar_prefetch = 0 : i64, scratch_operands = 0 : i64, tpu.core_type = #tpu.core_type<tc>, window_params = [{transform_indices = @transform_0, window_bounds = array<i64: 24, 4>}, {pipeline_mode = #tpu.pipeline_mode<synchronous>, transform_indices = @transform_1, window_bounds = array<i64: 4, 128>}, {pipeline_mode = #tpu.pipeline_mode<synchronous>, transform_indices = @transform_2, window_bounds = array<i64: 1, 128>}, {pipeline_mode = #tpu.pipeline_mode<synchronous>, transform_indices = @transform_3, window_bounds = array<i64: 128, 128>}, {pipeline_mode = #tpu.pipeline_mode<synchronous>, transform_indices = @transform_4, window_bounds = array<i64: 1, 128>}, {pipeline_mode = #tpu.pipeline_mode<synchronous>, transform_indices = @transform_5, window_bounds = array<i64: 128, 2>}, {pipeline_mode = #tpu.pipeline_mode<synchronous>, transform_indices = @transform_6, window_bounds = array<i64: 1, 2>}, {transform_indices = @transform_7, window_bounds = array<i64: 24, 2>}]} {
    %c0 = arith.constant 0 : index
    %c0_0 = arith.constant 0 : index
    %0 = vector.load %arg1[%c0, %c0_0] : memref<24x4xf32, #tpu.memory_space<vmem>>, vector<24x4xf32>
    %1 = arith.truncf %0 : vector<24x4xf32> to vector<24x4xbf16>
    %c0_1 = arith.constant 0 : index
    %c0_2 = arith.constant 0 : index
    %2 = vector.load %arg2[%c0_1, %c0_2] : memref<4x128xbf16, #tpu.memory_space<vmem>>, vector<4x128xbf16>
    %cst = arith.constant dense<0.000000e+00> : vector<24x128xf32>
    %3 = tpu.matmul %1, %2, %cst {dimension_numbers = #tpu.dot_dimension_numbers<[1], [0], [0], [1], [0, 0, 1, 1], [], []>} : vector<24x4xbf16>, vector<4x128xbf16>, vector<24x128xf32> -> vector<24x128xf32>
    %c0_3 = arith.constant 0 : index
    %c0_4 = arith.constant 0 : index
    %4 = vector.load %arg3[%c0_3, %c0_4] : memref<1x128xf32, #tpu.memory_space<vmem>>, vector<1x128xf32>
    %5 = vector.broadcast %4 : vector<1x128xf32> to vector<24x128xf32>
    %6 = arith.addf %3, %5 : vector<24x128xf32>
    %cst_5 = arith.constant 0.000000e+00 : f32
    %7 = vector.broadcast %cst_5 : f32 to vector<24x128xf32>
    %8 = arith.maximumf %6, %7 : vector<24x128xf32>
    %9 = arith.truncf %8 : vector<24x128xf32> to vector<24x128xbf16>
    %c0_6 = arith.constant 0 : index
    %c0_7 = arith.constant 0 : index
    %10 = vector.load %arg4[%c0_6, %c0_7] : memref<128x128xbf16, #tpu.memory_space<vmem>>, vector<128x128xbf16>
    %cst_8 = arith.constant dense<0.000000e+00> : vector<24x128xf32>
    %11 = tpu.matmul %9, %10, %cst_8 {dimension_numbers = #tpu.dot_dimension_numbers<[1], [0], [0], [1], [0, 0, 1, 1], [], []>} : vector<24x128xbf16>, vector<128x128xbf16>, vector<24x128xf32> -> vector<24x128xf32>
    %c0_9 = arith.constant 0 : index
    %c0_10 = arith.constant 0 : index
    %12 = vector.load %arg5[%c0_9, %c0_10] : memref<1x128xf32, #tpu.memory_space<vmem>>, vector<1x128xf32>
    %13 = vector.broadcast %12 : vector<1x128xf32> to vector<24x128xf32>
    %14 = arith.addf %11, %13 : vector<24x128xf32>
    %cst_11 = arith.constant 0.000000e+00 : f32
    %15 = vector.broadcast %cst_11 : f32 to vector<24x128xf32>
    %16 = arith.maximumf %14, %15 : vector<24x128xf32>
    %17 = arith.truncf %16 : vector<24x128xf32> to vector<24x128xbf16>
    %c0_12 = arith.constant 0 : index
    %c0_13 = arith.constant 0 : index
    %18 = vector.load %arg6[%c0_12, %c0_13] : memref<128x2xbf16, #tpu.memory_space<vmem>>, vector<128x2xbf16>
    %cst_14 = arith.constant dense<0.000000e+00> : vector<24x2xf32>
    %19 = tpu.matmul %17, %18, %cst_14 {dimension_numbers = #tpu.dot_dimension_numbers<[1], [0], [0], [1], [0, 0, 1, 1], [], []>} : vector<24x128xbf16>, vector<128x2xbf16>, vector<24x2xf32> -> vector<24x2xf32>
    %c0_15 = arith.constant 0 : index
    %c0_16 = arith.constant 0 : index
    %20 = vector.load %arg7[%c0_15, %c0_16] : memref<1x2xf32, #tpu.memory_space<vmem>>, vector<1x2xf32>
    %21 = vector.broadcast %20 : vector<1x2xf32> to vector<24x2xf32>
    %22 = arith.addf %19, %21 : vector<24x2xf32>
    %c0_17 = arith.constant 0 : index
    %c0_18 = arith.constant 0 : index
    %23 = vector.load %arg8[%c0_17, %c0_18] : memref<24x2xf32, #tpu.memory_space<vmem>>, vector<24x2xf32>
    tpu.vector_store %arg8[%c0_17, %c0_18], %22 {strides = array<i32>} : memref<24x2xf32, #tpu.memory_space<vmem>>, vector<24x2xf32>,
    return
  }
  func.func @transform_0(%arg0: i32) -> (i32, i32) {
    %c0_i32 = arith.constant 0 : i32
    %c0_i32_0 = arith.constant 0 : i32
    return %arg0, %c0_i32 : i32, i32
  }
  func.func @transform_1(%arg0: i32) -> (i32, i32) {
    %c0_i32 = arith.constant 0 : i32
    %c0_i32_0 = arith.constant 0 : i32
    %c0_i32_1 = arith.constant 0 : i32
    return %c0_i32, %c0_i32_0 : i32, i32
  }
  func.func @transform_2(%arg0: i32) -> (i32, i32) {
    %c0_i32 = arith.constant 0 : i32
    %c0_i32_0 = arith.constant 0 : i32
    %c0_i32_1 = arith.constant 0 : i32
    return %c0_i32, %c0_i32_0 : i32, i32
  }
  func.func @transform_3(%arg0: i32) -> (i32, i32) {
    %c0_i32 = arith.constant 0 : i32
    %c0_i32_0 = arith.constant 0 : i32
    %c0_i32_1 = arith.constant 0 : i32
    return %c0_i32, %c0_i32_0 : i32, i32
  }
  func.func @transform_4(%arg0: i32) -> (i32, i32) {
    %c0_i32 = arith.constant 0 : i32
    %c0_i32_0 = arith.constant 0 : i32
    %c0_i32_1 = arith.constant 0 : i32
    return %c0_i32, %c0_i32_0 : i32, i32
  }
  func.func @transform_5(%arg0: i32) -> (i32, i32) {
    %c0_i32 = arith.constant 0 : i32
    %c0_i32_0 = arith.constant 0 : i32
    %c0_i32_1 = arith.constant 0 : i32
    return %c0_i32, %c0_i32_0 : i32, i32
  }
  func.func @transform_6(%arg0: i32) -> (i32, i32) {
    %c0_i32 = arith.constant 0 : i32
    %c0_i32_0 = arith.constant 0 : i32
    %c0_i32_1 = arith.constant 0 : i32
    return %c0_i32, %c0_i32_0 : i32, i32
  }
  func.func @transform_7(%arg0: i32) -> (i32, i32) {
    %c0_i32 = arith.constant 0 : i32
    %c0_i32_0 = arith.constant 0 : i32
    return %arg0, %c0_i32 : i32, i32
  }
}

</mosaic_0001>

<bundles_post_ra>
// kernel: tpu_custom_call.1
= control target key start
LH: loop header
LB: loop body
LE: loop exit
PB: predicated region body
PF: predicated region fallthrough
CT: control target
= control target key end

     0   :  { %s835_s24 = smov 0   ;;  %s919_s0 = inlined_call_operand.vmem [shape: f32[48,4], index: 0, kind: input, shape index: {}]   ;;  %s920_s1 = inlined_call_operand.vmem [shape: bf16[4,128], index: 1, kind: input, shape index: {}]   ;;  %s921_s2 = inlined_call_operand.vmem [shape: f32[1,128], index: 2, kind: input, shape index: {}]   ;;  %s922_s3 = inlined_call_operand.vmem [shape: bf16[128,128], index: 3, kind: input, shape index: {}]   ;;  %s923_s4 = inlined_call_operand.vmem [shape: f32[1,128], index: 4, kind: input, shape index: {}]   ;;  %s924_s5 = inlined_call_operand.vmem [shape: bf16[128,2], index: 5, kind: input, shape index: {}]   ;;  %s925_s6 = inlined_call_operand.vmem [shape: f32[1,2], index: 6, kind: input, shape index: {}]   ;;  %s926_s7 = inlined_call_operand.vmem [shape: f32[48,2], index: 7, kind: output, shape index: {}]  }
   0x1 LB: > { %s663_s25 = sadd.s32 4294967295, %s793_s24   ;;  %p667_p0 = scmp.ge.s32.totalorder %s793_s24, 1  ;;  %s793_s24 = sphi %s835_s24, %s17_s24  }
   0x2   : > { %p238_p1 = scmp.lt.s32.totalorder %s793_s24, 3 }
   0x4   : > { %p239_p2 = pnand %p667_p0, %p238_p1 }
   0x5   : > { %v288_v0 = vld [vmem:[%s920_s1] sm:$0x3] (!%p239_p2)  ;;  %vm303_vm0 = vcmask (!%p239_p2), 1041408   ;;  %s270_s28 = smul.u32 (!%p239_p2), 3, %s663_s25  ;;  %v772_v3 = vld [vmem:[%s922_s3 + $0x8] sm:$0xff] (!%p239_p2)   ;;  %v773_v4 = vld [vmem:[%s922_s3 + $0x10] sm:$0xff] (!%p239_p2)  }
   0x6   : > { %242 = sbr.rel (%p239_p2) target bundleno = 682 (0x2aa), region = 48  ;;  %v771_v1 = vld [vmem:[%s922_s3] sm:$0xff] (!%p239_p2)   ;;  %762 = vmatprep.subr.msk.bf16.mxu0 (!%p239_p2), %vm303_vm0, %v288_v0  ;;  %v305_v2 = vsel (!%p239_p2), %vm303_vm0, %v288_v0, 0  ;;  %v774_v5 = vld [vmem:[%s922_s3 + $0x18] sm:$0xff] (!%p239_p2)   ;;  %vm296_vm1 = vcmask (!%p239_p2), 31744   ;;  %v776_v12 = vld [vmem:[%s922_s3 + $0x28] sm:$0xff] (!%p239_p2)  }
   0x7   : > { %717 = vmatpush3.bf16.msra.mxu0 (!%p239_p2), %v305_v2  ;;  %p271_p3 = scmp.lt.s32.totalorder (!%p239_p2), %s270_s28, 5  ;;  %722 = vmatprep.subr.bf16.mxu1 (!%p239_p2), %v771_v1  ;;  %v775_v11 = vld [vmem:[%s922_s3 + $0x20] sm:$0xff] (!%p239_p2)   ;;  %v777_v13 = vld [vmem:[%s922_s3 + $0x30] sm:$0xff] (!%p239_p2)   ;;  %v778_v14 = vld [vmem:[%s922_s3 + $0x38] sm:$0xff] (!%p239_p2)   ;;  %vm603_vm2 = vcmask (!%p239_p2), 15360  }
   0x8   : > { %723 = vmatpush3.bf16.msra.mxu1 (!%p239_p2), %v771_v1  ;;  %v779_v15 = vld [vmem:[%s924_s5] sm:$0xff] (!%p239_p2)   ;;  %v780_v16 = vld [vmem:[%s924_s5 + $0x8] sm:$0xff] (!%p239_p2)   ;;  %v781_v17 = vld [vmem:[%s924_s5 + $0x10] sm:$0xff] (!%p239_p2)  }
   0x9   : > { %724 = vmatprep.subr.bf16.mxu1 (!%p239_p2), %v772_v3  ;;  %742 = vmatprep.subr.bf16.mxu0 (!%p239_p2), %v779_v15  ;;  %v782_v18 = vld [vmem:[%s924_s5 + $0x18] sm:$0xff] (!%p239_p2)   ;;  %v783_v19 = vld [vmem:[%s924_s5 + $0x20] sm:$0xff] (!%p239_p2)   ;;  %v784_v20 = vld [vmem:[%s924_s5 + $0x28] sm:$0xff] (!%p239_p2)  }
   0xa   : > { %v670_v21 = vld [vmem:[%s921_s2] ss:$0 sm:$0xff] (!%p239_p2)  ;;  %v785_v34 = vld [vmem:[%s924_s5 + $0x30] sm:$0xff] (!%p239_p2)   ;;  %v786_v35 = vld [vmem:[%s924_s5 + $0x38] sm:$0xff] (!%p239_p2)  }
   0xb   : > { %v673_v36 = vld [vmem:[%s923_s4] ss:$0 sm:$0xff] (!%p239_p2) }
   0xc   : > { %725 = vmatpush3.bf16.msra.mxu1 (!%p239_p2), %v772_v3  ;;  %v682_v49 = vld [vmem:[%s925_s6] ss:$0 sm:$0xff] (!%p239_p2) }
   0xd   : > { %s928_s28 = smov (!%p271_p3, %s270_s28), 5  ;;  %726 = vmatprep.subr.bf16.mxu1 %v773_v4 }
   0xe   : > { %s668_s12 = sshll.u32 %s928_s28, 3 }
   0xf   : > { %s274_s17 = scalar_lea.vmem %s919_s0, %s668_s12  ;;  %s280_s9 = scalar_lea.vmem %s926_s7, %s668_s12 }
  0x10   : > { %v283_v6 = vld [vmem:[%s274_s17] sm:$0xff]  ;;  %v284_v7 = vld [vmem:[%s274_s17 + $0x8] sm:$0xff]  ;;  %v285_v8 = vld [vmem:[%s274_s17 + $0x10] sm:$0xff]  ;;  %727 = vmatpush3.bf16.msra.mxu1 %v773_v4 }
  0x11   : > { %v286_v9 = vpack.c.bf16 %v284_v7, %v283_v6  ;;  %v287_v10 = vpack.c.bf16 %v285_v8, %v285_v8  ;;  %728 = vmatprep.subr.bf16.mxu1 %v774_v5 }
  0x13   : > { %718 = vmatprep.mubr.msk.bf16.mxu0 %vm296_vm1, %v286_v9 }
  0x14   : > { %719 = vmatmul.mubr.msk.bf16.vlgmr.msra.gmra.mrb[0].mxu0 %vm296_vm1, %v287_v10  ;;  %729 = vmatpush3.bf16.msra.mxu1 %v774_v5 }
  0x15   : > { %730 = vmatprep.subr.bf16.mxu1 %v775_v11  ;;  %743 = vmatpush3.bf16.msra.mxu0 %v779_v15 }
  0x16   : > { %744 = vmatprep.subr.bf16.mxu0 %v780_v16 }
  0x18   : > { %731 = vmatpush3.bf16.msra.mxu1 %v775_v11 }
  0x19   : > { %732 = vmatprep.subr.bf16.mxu1 %v776_v12  ;;  %745 = vmatpush3.bf16.msra.mxu0 %v780_v16 }
  0x1a   : > { %746 = vmatprep.subr.bf16.mxu0 %v781_v17 }
  0x1c   : > { %733 = vmatpush3.bf16.msra.mxu1 %v776_v12 }
  0x1d   : > { %734 = vmatprep.subr.bf16.mxu1 %v777_v13  ;;  %747 = vmatpush3.bf16.msra.mxu0 %v781_v17 }
  0x1e   : > { %748 = vmatprep.subr.bf16.mxu0 %v782_v18 }
  0x20   : > { %735 = vmatpush3.bf16.msra.mxu1 %v777_v13 }
  0x21   : > { %736 = vmatprep.subr.bf16.mxu1 %v778_v14  ;;  %749 = vmatpush3.bf16.msra.mxu0 %v782_v18 }
  0x22   : > { %750 = vmatprep.subr.bf16.mxu0 %v783_v19 }
  0x24   : > { %737 = vmatpush3.bf16.msra.mxu1 %v778_v14 }
  0x25   : > { %751 = vmatpush3.bf16.msra.mxu0 %v783_v19 }
  0x26   : > { %752 = vmatprep.subr.bf16.mxu0 %v784_v20 }
  0x29   : > { %753 = vmatpush3.bf16.msra.mxu0 %v784_v20 }
  0x2a   : > { %754 = vmatprep.subr.bf16.mxu0 %v785_v34 }
  0x2d   : > { %755 = vmatpush3.bf16.msra.mxu0 %v785_v34 }
  0x2e   : > { %756 = vmatprep.subr.bf16.mxu0 %v786_v35 }
  0x31   : > { %757 = vmatpush3.bf16.msra.mxu0 %v786_v35 }
  0xe7   : > { %v720_v22 = vpop.f32.mrb[0].mxu0 }
  0xe8   : > { %v350_v23 = vadd.f32 %v720_v22, %v670_v21  ;;  %v341_v24 = vpop.f32.mrb[1].mxu0 }
  0xe9   : > { %v342_v25 = vadd.f32 %v670_v21, %v341_v24  ;;  %v721_v26 = vpop.f32.mrb[2].mxu0 }
  0xea   : > { %v344_v27 = vpop.f32.mrb[3].mxu0  ;;  %v357_v29 = vmax.f32 %v350_v23, 0.0 }
  0xeb   : > { %v345_v28 = vadd.f32 %v670_v21, %v344_v27  ;;  %v355_v30 = vmax.f32 %v342_v25, 0.0 }
  0xec   : > { %v359_v33 = vpack.c.bf16 %v357_v29, %v357_v29 }
  0xed   : > { %v356_v31 = vmax.f32 %v345_v28, 0.0 }
  0xef   : > { %v358_v32 = vpack.c.bf16 %v356_v31, %v355_v30 }
  0xf1   : > { %738 = vmatprep.mubr.bf16.mxu1 %v358_v32 }
  0xf2   : > { %739 = vmatmul.mubr.bf16.vlgmr.msra.gmra.mrb[0].mxu1 %v359_v33 }
 0x1c5   : > { %v740_v37 = vpop.f32.mrb[0].mxu1 }
 0x1c6   : > { %v474_v38 = vadd.f32 %v740_v37, %v673_v36  ;;  %v465_v39 = vpop.f32.mrb[1].mxu1 }
 0x1c7   : > { %v466_v40 = vadd.f32 %v673_v36, %v465_v39  ;;  %v741_v41 = vpop.f32.mrb[2].mxu1 }
 0x1c8   : > { %v468_v42 = vpop.f32.mrb[3].mxu1  ;;  %v481_v44 = vmax.f32 %v474_v38, 0.0 }
 0x1c9   : > { %v469_v43 = vadd.f32 %v673_v36, %v468_v42  ;;  %v479_v45 = vmax.f32 %v466_v40, 0.0 }
 0x1ca   : > { %v483_v48 = vpack.c.bf16 %v481_v44, %v481_v44 }
 0x1cb   : > { %v480_v46 = vmax.f32 %v469_v43, 0.0 }
 0x1cd   : > { %v482_v47 = vpack.c.bf16 %v480_v46, %v479_v45 }
 0x1cf   : > { %758 = vmatprep.mubr.bf16.mxu0 %v482_v47 }
 0x1d0   : > { %759 = vmatmul.mubr.bf16.vlgmr.msra.gmra.mrb[4].mxu0 %v483_v48 }
 0x2a3   : > { %v760_v50 = vpop.f32.mrb[4].mxu0 }
 0x2a4   : > { %v598_v51 = vadd.f32 %v760_v50, %v682_v49  ;;  %v589_v52 = vpop.f32.mrb[5].mxu0 }
 0x2a5   : > { %v590_v53 = vadd.f32 %v682_v49, %v589_v52  ;;  %v761_v54 = vpop.f32.mrb[6].mxu0 }
 0x2a6   : > { %606 = vst.msk [vmem:[%s280_s9 + $0x10] sm:$0xff] %vm603_vm2, %v598_v51  ;;  %v592_v55 = vpop.f32.mrb[7].mxu0 }
 0x2a7   : > { %604 = vst.msk [vmem:[%s280_s9] sm:$0xff] %vm603_vm2, %v590_v53  ;;  %v593_v56 = vadd.f32 %v682_v49, %v592_v55 }
 0x2a9   : > { %605 = vst.msk [vmem:[%s280_s9 + $0x8] sm:$0xff] %vm603_vm2, %v593_v56 }
 0x2aa PF: > { %s17_s24 = sadd.s32 1, %s793_s24  }
 0x2ab   : > { %p14_p4 = scmp.ge.s32.totalorder %s17_s24, 4  }
 0x2ad   :  { %16 = sbr.rel (!%p14_p4) target bundleno = 1 (0x1), region = 78 }

</bundles_post_ra>
